<compile_context>
chip_gen: v7x
topology: tpu7x:2x2x1
jax: 0.10.0
libtpu: 0.0.40
codegen_flags: <defaults>
</compile_context>

<pallas_src>
import math

import jax
import jax.numpy as jnp
from jax.experimental import pallas as pl
from jax.experimental.pallas import tpu as pltpu

HID1 = 400          # logical hidden sizes (PyTorch module)
HID2 = 300
HID1_PAD = 512      # padded sizes used by the kernel
HID2_PAD = 512      # v5e-only deployments may use 384 (128-aligned) instead
A_PAD = 128         # lane-dense per-head width (mean / log_std)


def _round_up(x, m):
    return ((x + m - 1) // m) * m


def _actor_kernel(state_ref, w1_ref, b1_ref, w2_ref, b2_ref, wh_ref, bh_ref,
                  noise_ref, ma_ref, out_ref):
    # LHS cast to bf16 right before every dot; weights are already bf16 in VMEM.
    # bf16 x bf16 -> f32 accumulate is the native MXU fast path on v5e/v6e/v7x.
    x = state_ref[...].astype(jnp.bfloat16)

    # layer 1 + relu
    a = jnp.dot(x, w1_ref[...], preferred_element_type=jnp.float32) + b1_ref[...]
    a = jnp.maximum(a, 0.0)                       # relu in f32 (v5e-safe)

    # layer 2 + relu
    a = jnp.dot(a.astype(jnp.bfloat16), w2_ref[...],
                preferred_element_type=jnp.float32) + b2_ref[...]
    a = jnp.maximum(a, 0.0)

    # fused [mean | log_std] head: single (HID2_PAD, 2*A_PAD) matmul, then split
    head = jnp.dot(a.astype(jnp.bfloat16), wh_ref[...],
                   preferred_element_type=jnp.float32) + bh_ref[...]
    mean_a = head[:, :A_PAD]
    log_std_a = head[:, A_PAD:]

    # reparameterized sample + squash (EUP: exp / tanh).
    # NOTE: the original RegularActor.forward does not clamp log_std, so neither do we.
    z = mean_a + jnp.exp(log_std_a) * noise_ref[...]
    max_action = ma_ref[0, 0]
    out_ref[...] = (max_action * jnp.tanh(z)).astype(out_ref.dtype)


def pack_params(params, weight_dtype=jnp.bfloat16,
                hid1_pad=HID1_PAD, hid2_pad=HID2_PAD):
    """Zero-pad to lane-aligned shapes, fuse the two heads, cast weights to bf16.

    Padded bias entries are zero so relu keeps padded hidden units at exactly 0;
    padded head columns contribute 0 (zero weights/bias, zero noise padding) and
    are sliced off before use. state rows of W1 are padded to a multiple of 128
    so the state tile is lane-dense.
    """
    w1, b1, w2, b2, wm, bm, ws, bs = params

    def pad2(x, rows, cols):
        out = jnp.zeros((rows, cols), x.dtype)
        return out.at[: x.shape[0], : x.shape[1]].set(x)

    s_pad = _round_up(w1.shape[0], 128)
    w1p = pad2(w1, s_pad, hid1_pad).astype(weight_dtype)
    b1p = pad2(b1, 1, hid1_pad).astype(jnp.float32)
    w2p = pad2(w2, hid1_pad, hid2_pad).astype(weight_dtype)
    b2p = pad2(b2, 1, hid2_pad).astype(jnp.float32)
    whp = jnp.concatenate(
        [pad2(wm, hid2_pad, A_PAD), pad2(ws, hid2_pad, A_PAD)], axis=1
    ).astype(weight_dtype)
    bhp = jnp.concatenate(
        [pad2(bm, 1, A_PAD), pad2(bs, 1, A_PAD)], axis=1
    ).astype(jnp.float32)
    return w1p, b1p, w2p, b2p, whp, bhp


def regular_actor_forward(state, packed_params, noise, max_action, *, block_b=512):
    """state: (B, state_dim) f32; noise: (B, action_dim) f32 ~ N(0,1)."""
    w1p, b1p, w2p, b2p, whp, bhp = packed_params
    B, S = state.shape
    A = noise.shape[1]
    S_PAD = w1p.shape[0]
    H1 = w1p.shape[1]
    H2 = w2p.shape[1]

    # Balanced batch tiles: minimize padded rows while amortizing per-step
    # overhead; keep >=2 tiles for large batches so v7x's two TensorCores are
    # both used via the "parallel" grid axis.
    n_tiles = -(-B // block_b)
    if B >= 256:
        n_tiles = max(n_tiles, 2)
    tb = _round_up(-(-B // n_tiles), 8)
    b_pad = tb * n_tiles

    state_p = jnp.zeros((b_pad, S_PAD), jnp.float32).at[:B, :S].set(state)
    noise_p = jnp.zeros((b_pad, A_PAD), jnp.float32).at[:B, :A].set(noise)
    ma = jnp.full((1, 1), max_action, jnp.float32)

    const2d = lambda arr: pl.BlockSpec(arr.shape, lambda i: (0, 0))
    in_specs = [
        pl.BlockSpec((tb, S_PAD), lambda i: (i, 0)),           # state tile (lane-dense)
        const2d(w1p), const2d(b1p),                            # weights stay VMEM-resident
        const2d(w2p), const2d(b2p),
        const2d(whp), const2d(bhp),
        pl.BlockSpec((tb, A_PAD), lambda i: (i, 0)),           # noise tile
        pl.BlockSpec(memory_space=pltpu.MemorySpace.SMEM),     # max_action scalar
    ]
    out_spec = pl.BlockSpec((tb, A_PAD), lambda i: (i, 0))

    # Advisory cost estimate (whole call, padded shapes).
    flops = 2 * b_pad * (S_PAD * H1 + H1 * H2 + H2 * 2 * A_PAD)
    transcendentals = 2 * b_pad * A_PAD                      # exp + tanh
    bytes_accessed = (
        2 * (w1p.size + w2p.size + whp.size)                 # bf16 weights
        + 4 * (b1p.size + b2p.size + bhp.size)               # f32 biases
        + 4 * b_pad * (S_PAD + 2 * A_PAD)                    # state + noise + out
    )

    out = pl.pallas_call(
        _actor_kernel,
        out_shape=jax.ShapeDtypeStruct((b_pad, A_PAD), jnp.float32),
        grid=(n_tiles,),
        in_specs=in_specs,
        out_specs=out_spec,
        compiler_params=pltpu.CompilerParams(
            dimension_semantics=("parallel",),
        ),
        cost_estimate=pl.CostEstimate(
            flops=int(flops),
            transcendentals=int(transcendentals),
            bytes_accessed=int(bytes_accessed),
        ),
    )(state_p, w1p, b1p, w2p, b2p, whp, bhp, noise_p, ma)

    return out[:B, :A]


def init_params(key, state_dim, action_dim):
    """Deterministic init mimicking nn.Linear default (uniform +/- 1/sqrt(fan_in)).
    Weights stored as (in_features, out_features), logical (unpadded) sizes."""
    dims = [(state_dim, HID1), (HID1, HID2), (HID2, action_dim), (HID2, action_dim)]
    params = []
    for (fan_in, fan_out) in dims:
        key, kw, kb = jax.random.split(key, 3)
        bound = 1.0 / math.sqrt(fan_in)
        w = jax.random.uniform(kw, (fan_in, fan_out), jnp.float32, -bound, bound)
        b = jax.random.uniform(kb, (1, fan_out), jnp.float32, -bound, bound)
        params += [w, b]
    return tuple(params)


def reference_forward(state, params, noise, max_action):
    """Plain-JAX reference mirroring the kernel's bf16-operand / f32-accumulate math."""
    w1, b1, w2, b2, wm, bm, ws, bs = params
    bf = lambda t: t.astype(jnp.bfloat16)
    dot = lambda x, w: jnp.dot(bf(x), bf(w), preferred_element_type=jnp.float32)
    a = jnp.maximum(dot(state, w1) + b1, 0.0)
    a = jnp.maximum(dot(a, w2) + b2, 0.0)
    mean_a = dot(a, wm) + bm
    log_std_a = dot(a, ws) + bs
    z = mean_a + jnp.exp(log_std_a) * noise
    return max_action * jnp.tanh(z)


if __name__ == "__main__":
    key = jax.random.PRNGKey(0)
    B, state_dim, action_dim = 4, 16, 8
    max_action = 1.0

    kp, ks, kn = jax.random.split(key, 3)
    params = init_params(kp, state_dim, action_dim)
    packed = pack_params(params)
    state = jax.random.normal(ks, (B, state_dim), jnp.float32)
    # N(0,1) noise for the reparameterization trick (torch draws it inside forward)
    noise = jax.random.normal(kn, (B, action_dim), jnp.float32)

    out = regular_actor_forward(state, packed, noise, max_action)
    out = jax.block_until_ready(out)

    ref = reference_forward(state, params, noise, max_action)
    assert out.shape == (B, action_dim)
    assert bool(jnp.all(jnp.isfinite(out)))
    assert jnp.allclose(out, ref, atol=2e-3, rtol=2e-3), "mismatch vs JAX reference"

    # TODO(synk): sample_multiple / log_pis methods of RegularActor are not
    # implemented here (forward pass only).
    print("KERNEL_OK")
</pallas_src>

<mosaic_0001>
module attributes {stable_mosaic.version = 11 : i64} {
  func.func @_actor_kernel(%arg0: i32, %arg1: memref<8x128xf32, #tpu.memory_space<vmem>>, %arg2: memref<128x512xbf16, #tpu.memory_space<vmem>>, %arg3: memref<1x512xf32, #tpu.memory_space<vmem>>, %arg4: memref<512x512xbf16, #tpu.memory_space<vmem>>, %arg5: memref<1x512xf32, #tpu.memory_space<vmem>>, %arg6: memref<512x256xbf16, #tpu.memory_space<vmem>>, %arg7: memref<1x256xf32, #tpu.memory_space<vmem>>, %arg8: memref<8x128xf32, #tpu.memory_space<vmem>>, %arg9: memref<1x1xf32, #tpu.memory_space<smem>>, %arg10: memref<8x128xf32, #tpu.memory_space<vmem>>) attributes {dimension_semantics = [#tpu.dimension_semantics<parallel>], iteration_bounds = array<i64: 1>, scalar_prefetch = 0 : i64, scratch_operands = 0 : i64, tpu.core_type = #tpu.core_type<tc>, window_params = [{transform_indices = @transform_0, window_bounds = array<i64: 8, 128>}, {pipeline_mode = #tpu.pipeline_mode<synchronous>, transform_indices = @transform_1, window_bounds = array<i64: 128, 512>}, {pipeline_mode = #tpu.pipeline_mode<synchronous>, transform_indices = @transform_2, window_bounds = array<i64: 1, 512>}, {pipeline_mode = #tpu.pipeline_mode<synchronous>, transform_indices = @transform_3, window_bounds = array<i64: 512, 512>}, {pipeline_mode = #tpu.pipeline_mode<synchronous>, transform_indices = @transform_4, window_bounds = array<i64: 1, 512>}, {pipeline_mode = #tpu.pipeline_mode<synchronous>, transform_indices = @transform_5, window_bounds = array<i64: 512, 256>}, {pipeline_mode = #tpu.pipeline_mode<synchronous>, transform_indices = @transform_6, window_bounds = array<i64: 1, 256>}, {transform_indices = @transform_7, window_bounds = array<i64: 8, 128>}, {transform_indices = @transform_8, window_bounds = array<i64: 1, 1>}, {transform_indices = @transform_9, window_bounds = array<i64: 8, 128>}]} {
    %c0 = arith.constant 0 : index
    %c0_0 = arith.constant 0 : index
    %0 = vector.load %arg1[%c0, %c0_0] : memref<8x128xf32, #tpu.memory_space<vmem>>, vector<8x128xf32>
    %1 = arith.truncf %0 : vector<8x128xf32> to vector<8x128xbf16>
    %c0_1 = arith.constant 0 : index
    %c0_2 = arith.constant 0 : index
    %2 = vector.load %arg2[%c0_1, %c0_2] : memref<128x512xbf16, #tpu.memory_space<vmem>>, vector<128x512xbf16>
    %cst = arith.constant dense<0.000000e+00> : vector<8x512xf32>
    %3 = tpu.matmul %1, %2, %cst {dimension_numbers = #tpu.dot_dimension_numbers<[1], [0], [0], [1], [0, 0, 1, 1], [], []>} : vector<8x128xbf16>, vector<128x512xbf16>, vector<8x512xf32> -> vector<8x512xf32>
    %c0_3 = arith.constant 0 : index
    %c0_4 = arith.constant 0 : index
    %4 = vector.load %arg3[%c0_3, %c0_4] : memref<1x512xf32, #tpu.memory_space<vmem>>, vector<1x512xf32>
    %5 = vector.broadcast %4 : vector<1x512xf32> to vector<8x512xf32>
    %6 = arith.addf %3, %5 : vector<8x512xf32>
    %cst_5 = arith.constant 0.000000e+00 : f32
    %7 = vector.broadcast %cst_5 : f32 to vector<8x512xf32>
    %8 = arith.maximumf %6, %7 : vector<8x512xf32>
    %9 = arith.truncf %8 : vector<8x512xf32> to vector<8x512xbf16>
    %c0_6 = arith.constant 0 : index
    %c0_7 = arith.constant 0 : index
    %10 = vector.load %arg4[%c0_6, %c0_7] : memref<512x512xbf16, #tpu.memory_space<vmem>>, vector<512x512xbf16>
    %cst_8 = arith.constant dense<0.000000e+00> : vector<8x512xf32>
    %11 = tpu.matmul %9, %10, %cst_8 {dimension_numbers = #tpu.dot_dimension_numbers<[1], [0], [0], [1], [0, 0, 1, 1], [], []>} : vector<8x512xbf16>, vector<512x512xbf16>, vector<8x512xf32> -> vector<8x512xf32>
    %c0_9 = arith.constant 0 : index
    %c0_10 = arith.constant 0 : index
    %12 = vector.load %arg5[%c0_9, %c0_10] : memref<1x512xf32, #tpu.memory_space<vmem>>, vector<1x512xf32>
    %13 = vector.broadcast %12 : vector<1x512xf32> to vector<8x512xf32>
    %14 = arith.addf %11, %13 : vector<8x512xf32>
    %cst_11 = arith.constant 0.000000e+00 : f32
    %15 = vector.broadcast %cst_11 : f32 to vector<8x512xf32>
    %16 = arith.maximumf %14, %15 : vector<8x512xf32>
    %17 = arith.truncf %16 : vector<8x512xf32> to vector<8x512xbf16>
    %c0_12 = arith.constant 0 : index
    %c0_13 = arith.constant 0 : index
    %18 = vector.load %arg6[%c0_12, %c0_13] : memref<512x256xbf16, #tpu.memory_space<vmem>>, vector<512x256xbf16>
    %cst_14 = arith.constant dense<0.000000e+00> : vector<8x256xf32>
    %19 = tpu.matmul %17, %18, %cst_14 {dimension_numbers = #tpu.dot_dimension_numbers<[1], [0], [0], [1], [0, 0, 1, 1], [], []>} : vector<8x512xbf16>, vector<512x256xbf16>, vector<8x256xf32> -> vector<8x256xf32>
    %c0_15 = arith.constant 0 : index
    %c0_16 = arith.constant 0 : index
    %20 = vector.load %arg7[%c0_15, %c0_16] : memref<1x256xf32, #tpu.memory_space<vmem>>, vector<1x256xf32>
    %21 = vector.broadcast %20 : vector<1x256xf32> to vector<8x256xf32>
    %22 = arith.addf %19, %21 : vector<8x256xf32>
    %23 = vector.extract_strided_slice %22 {offsets = [0, 0], sizes = [8, 128], strides = [1, 1]} : vector<8x256xf32> to vector<8x128xf32>
    %24 = vector.extract_strided_slice %22 {offsets = [0, 128], sizes = [8, 128], strides = [1, 1]} : vector<8x256xf32> to vector<8x128xf32>
    %25 = math.exp %24 : vector<8x128xf32>
    %c0_17 = arith.constant 0 : index
    %c0_18 = arith.constant 0 : index
    %26 = vector.load %arg8[%c0_17, %c0_18] : memref<8x128xf32, #tpu.memory_space<vmem>>, vector<8x128xf32>
    %27 = arith.mulf %25, %26 : vector<8x128xf32>
    %28 = arith.addf %23, %27 : vector<8x128xf32>
    %c0_19 = arith.constant 0 : index
    %c0_20 = arith.constant 0 : index
    %29 = memref.load %arg9[%c0_19, %c0_20] : memref<1x1xf32, #tpu.memory_space<smem>>
    %30 = math.tanh %28 : vector<8x128xf32>
    %31 = vector.broadcast %29 : f32 to vector<8x128xf32>
    %32 = arith.mulf %31, %30 : vector<8x128xf32>
    %c0_21 = arith.constant 0 : index
    %c0_22 = arith.constant 0 : index
    %33 = vector.load %arg10[%c0_21, %c0_22] : memref<8x128xf32, #tpu.memory_space<vmem>>, vector<8x128xf32>
    tpu.vector_store %arg10[%c0_21, %c0_22], %32 {strides = array<i32>} : memref<8x128xf32, #tpu.memory_space<vmem>>, vector<8x128xf32>,
    return
  }
  func.func @transform_0(%arg0: i32) -> (i32, i32) {
    %c0_i32 = arith.constant 0 : i32
    %c0_i32_0 = arith.constant 0 : i32
    return %arg0, %c0_i32 : i32, i32
  }
  func.func @transform_1(%arg0: i32) -> (i32, i32) {
    %c0_i32 = arith.constant 0 : i32
    %c0_i32_0 = arith.constant 0 : i32
    %c0_i32_1 = arith.constant 0 : i32
    return %c0_i32, %c0_i32_0 : i32, i32
  }
  func.func @transform_2(%arg0: i32) -> (i32, i32) {
    %c0_i32 = arith.constant 0 : i32
    %c0_i32_0 = arith.constant 0 : i32
    %c0_i32_1 = arith.constant 0 : i32
    return %c0_i32, %c0_i32_0 : i32, i32
  }
  func.func @transform_3(%arg0: i32) -> (i32, i32) {
    %c0_i32 = arith.constant 0 : i32
    %c0_i32_0 = arith.constant 0 : i32
    %c0_i32_1 = arith.constant 0 : i32
    return %c0_i32, %c0_i32_0 : i32, i32
  }
  func.func @transform_4(%arg0: i32) -> (i32, i32) {
    %c0_i32 = arith.constant 0 : i32
    %c0_i32_0 = arith.constant 0 : i32
    %c0_i32_1 = arith.constant 0 : i32
    return %c0_i32, %c0_i32_0 : i32, i32
  }
  func.func @transform_5(%arg0: i32) -> (i32, i32) {
    %c0_i32 = arith.constant 0 : i32
    %c0_i32_0 = arith.constant 0 : i32
    %c0_i32_1 = arith.constant 0 : i32
    return %c0_i32, %c0_i32_0 : i32, i32
  }
  func.func @transform_6(%arg0: i32) -> (i32, i32) {
    %c0_i32 = arith.constant 0 : i32
    %c0_i32_0 = arith.constant 0 : i32
    %c0_i32_1 = arith.constant 0 : i32
    return %c0_i32, %c0_i32_0 : i32, i32
  }
  func.func @transform_7(%arg0: i32) -> (i32, i32) {
    %c0_i32 = arith.constant 0 : i32
    %c0_i32_0 = arith.constant 0 : i32
    return %arg0, %c0_i32 : i32, i32
  }
  func.func @transform_8(%arg0: i32) -> (i32, i32) {
    %c0_i32 = arith.constant 0 : i32
    %c0_i32_0 = arith.constant 0 : i32
    %c0_i32_1 = arith.constant 0 : i32
    return %c0_i32, %c0_i32_0 : i32, i32
  }
  func.func @transform_9(%arg0: i32) -> (i32, i32) {
    %c0_i32 = arith.constant 0 : i32
    %c0_i32_0 = arith.constant 0 : i32
    return %arg0, %c0_i32 : i32, i32
  }
}

</mosaic_0001>

<bundles_post_ra>
// kernel: tpu_custom_call.1
= control target key start
LH: loop header
LB: loop body
LE: loop exit
PB: predicated region body
PF: predicated region fallthrough
CT: control target
= control target key end

     0   :  { %15 = vsyncpa [#allocation4], 0  ;;  %s2739_s0 = inlined_call_operand.hbm [shape: f32[8,128], index: 0, kind: input, shape index: {}]   ;;  %s2740_s1 = inlined_call_operand.hbm [shape: bf16[128,512], index: 1, kind: input, shape index: {}]   ;;  %s2741_s2 = inlined_call_operand.vmem [shape: f32[1,512], index: 2, kind: input, shape index: {}]   ;;  %s2742_s3 = inlined_call_operand.hbm [shape: bf16[512,512], index: 3, kind: input, shape index: {}]   ;;  %s2743_s4 = inlined_call_operand.vmem [shape: f32[1,512], index: 4, kind: input, shape index: {}]   ;;  %s2744_s5 = inlined_call_operand.hbm [shape: bf16[512,256], index: 5, kind: input, shape index: {}]   ;;  %s2745_s6 = inlined_call_operand.vmem [shape: f32[1,256], index: 6, kind: input, shape index: {}]   ;;  %s2746_s7 = inlined_call_operand.vmem [shape: f32[8,128], index: 7, kind: input, shape index: {}]   ;;  %s2747_s8 = inlined_call_operand.<no memory space> [shape: f32[1,1], index: 8, kind: input, shape index: {}]   ;;  %s2748_s9 = inlined_call_operand.hbm [shape: f32[8,128], index: 9, kind: output, shape index: {}]  }
   0x1   :  { %16 = vsyncpa [#allocation7], 0 }
   0x2   :  { %17 = vsyncpa [#allocation10], 0 }
   0x3   :  { %18 = vsyncpa [#allocation5], 0  ;;  %s2565_s30 = smov [#allocation6]   ;;  %s2447_s13 = scalar_lea.hbm %s2740_s1, 4096 }
   0x4   :  { %s34_s10 = sshll.u32 %s2565_s30, 4  ;;  %p2448_p0 = scmp.ne.s32.totalorder %s2740_s1, %s2447_s13  ;;  %s35_s10 = int_to_ptr.vmem [resolvable:$true] %s34_s10 }
   0x5   :  { %p2451_p1 = scmp.lt.u32.totalorder %s2447_s13, %s2740_s1 }
   0x7   :  { %p2453_p2 = pnand %p2451_p1, %p2448_p0 }
   0x9   :  { %2456 = shalt.err (!%p2453_p2)
}
   0xa   :  { %s2457_s18 = scalar_lea.vmem %s35_s10, 4096  ;;  %p2462_p4 = scmp.lt.s32.totalorder %s35_s10, %s35_s10 }
   0xb   :  { %p2458_p3 = scmp.ne.s32.totalorder %s35_s10, %s2457_s18  ;;  %p2463_p5 = scmp.lt.s32.totalorder %s2457_s18, %s2457_s18 }
   0xd   :  { %p2464_p6 = por %p2463_p5, %p2462_p4 }
   0xf   :  { %p2465_p7 = pnand %p2464_p6, %p2458_p3 }
  0x11   :  { %2468 = shalt.err (!%p2465_p7)
}
  0x12   :  { %s2566_s19 = smov 256   ;;  %s2567_s20 = smov 16  }
  0x13   :  { %40 = dma.hbm_to_vmem [thread:$0]  %s2740_s1, 4096, %s35_s10, [#allocation7], %s2566_s19, %s2566_s19, %s2567_s20  }
  0x14   :  { %s2568_s23 = smov [#allocation3]   ;;  %s2569_s25 = smov [#allocation8]  }
  0x15   :  { %s25_s24 = sshll.u32 %s2568_s23, 4  ;;  %s48_s26 = sshll.u32 %s2569_s25, 4  ;;  %s26_s24 = int_to_ptr.vmem [resolvable:$true] %s25_s24  ;;  %s49_s26 = int_to_ptr.vmem [resolvable:$true] %s48_s26 }
  0x16   :  { %s2469_s29 = scalar_lea.hbm %s2739_s0, 128 }
  0x17   :  { %p2470_p8 = scmp.ne.s32.totalorder %s2739_s0, %s2469_s29  ;;  %p2473_p9 = scmp.lt.u32.totalorder %s2469_s29, %s2739_s0 }
  0x19   :  { %p2475_p10 = pnand %p2473_p9, %p2470_p8 }
  0x1b   :  { %2478 = shalt.err (!%p2475_p10)
}
  0x1c   :  { %s2479_s1 = scalar_lea.vmem %s26_s24, 128  ;;  %p2484_p12 = scmp.lt.s32.totalorder %s26_s24, %s26_s24 }
  0x1d   :  { %p2480_p11 = scmp.ne.s32.totalorder %s26_s24, %s2479_s1  ;;  %p2485_p13 = scmp.lt.s32.totalorder %s2479_s1, %s2479_s1 }
  0x1f   :  { %p2486_p0 = por %p2485_p13, %p2484_p12 }
  0x21   :  { %p2487_p1 = pnand %p2486_p0, %p2480_p11 }
  0x23   :  { %2490 = shalt.err (!%p2487_p1)
}
  0x24   :  { %28 = dma.hbm_to_vmem [thread:$0]  %s2739_s0, 128, %s26_s24, [#allocation4]  }
  0x25   :  { %s2491_s17 = scalar_lea.hbm %s2742_s3, 16384 }
  0x26   :  { %p2492_p2 = scmp.ne.s32.totalorder %s2742_s3, %s2491_s17  ;;  %p2495_p3 = scmp.lt.u32.totalorder %s2491_s17, %s2742_s3 }
  0x28   :  { %p2497_p4 = pnand %p2495_p3, %p2492_p2 }
  0x2a   :  { %2500 = shalt.err (!%p2497_p4)
}
  0x2b   :  { %s2501_s25 = scalar_lea.vmem %s49_s26, 16384  ;;  %p2506_p6 = scmp.lt.s32.totalorder %s49_s26, %s49_s26 }
  0x2c   :  { %p2502_p5 = scmp.ne.s32.totalorder %s49_s26, %s2501_s25  ;;  %p2507_p7 = scmp.lt.s32.totalorder %s2501_s25, %s2501_s25 }
  0x2e   :  { %p2508_p8 = por %p2507_p7, %p2506_p6 }
  0x30   :  { %p2509_p9 = pnand %p2508_p8, %p2502_p5 }
  0x32   :  { %2512 = shalt.err (!%p2509_p9)
}
  0x33   :  { %54 = dma.hbm_to_vmem [thread:$0]  %s2742_s3, 16384, %s49_s26, [#allocation7], %s2566_s19, %s2566_s19, %s2567_s20  }
  0x34   :  { %s2570_s27 = smov [#allocation9]   ;;  %s2513_s11 = scalar_lea.hbm %s2744_s5, 8192 }
  0x35   :  { %s62_s28 = sshll.u32 %s2570_s27, 4  ;;  %p2514_p10 = scmp.ne.s32.totalorder %s2744_s5, %s2513_s11  ;;  %s63_s28 = int_to_ptr.vmem [resolvable:$true] %s62_s28 }
  0x36   :  { %p2517_p11 = scmp.lt.u32.totalorder %s2513_s11, %s2744_s5 }
  0x38   :  { %p2519_p12 = pnand %p2517_p11, %p2514_p10 }
  0x3a   :  { %2522 = shalt.err (!%p2519_p12)
}
  0x3b   :  { %s2523_s14 = scalar_lea.vmem %s63_s28, 8192  ;;  %p2528_p0 = scmp.lt.s32.totalorder %s63_s28, %s63_s28 }
  0x3c   :  { %p2524_p13 = scmp.ne.s32.totalorder %s63_s28, %s2523_s14  ;;  %p2529_p1 = scmp.lt.s32.totalorder %s2523_s14, %s2523_s14 }
  0x3e   :  { %p2530_p2 = por %p2529_p1, %p2528_p0 }
  0x40   :  { %p2531_p3 = pnand %p2530_p2, %p2524_p13 }
  0x42   :  { %2534 = shalt.err (!%p2531_p3)
}
  0x43   :  { %s2571_s3 = smov 128   ;;  %s2572_s19 = smov 8  }
  0x44   :  { %68 = dma.hbm_to_vmem [thread:$0]  %s2744_s5, 8192, %s63_s28, [#allocation10], %s2571_s3, %s2571_s3, %s2572_s19  }
  0x45   :  { %2557 = dma.done.wait [#allocation4], 128  }
  0x46   :  { %2558 = vsyncadd [#allocation4], 4294967168 }
  0x47   :  { %2559 = dma.done.wait [#allocation7], 20480  }
  0x48   :  { %2560 = vsyncadd [#allocation7], 4294946816 }
  0x49   :  { %2561 = dma.done.wait [#allocation10], 8192  }
  0x4a   :  { %2562 = vsyncadd [#allocation10], 4294959104  ;;  %v2573_v0 = vmov 0   ;;  %v2107_v1 = vld [vmem:[#allocation6 + $0x4] ss:$16 sps:$4 sm:$0xff]   ;;  %v88_v26 = vld [vmem:[#allocation3] sm:$0xff] }
  0x4b   :  { %336 = vmatprep.mubr.bf16.mxu0 %v2573_v0  ;;  %377 = vmatprep.mubr.bf16.mxu1 %v2573_v0  ;;  %v2109_v2 = vld [vmem:[#allocation6] ss:$16 sps:$4 sm:$0xff]   ;;  %v2110_v3 = vld [vmem:[#allocation6 + $0x24] ss:$16 sps:$4 sm:$0xff]   ;;  %v2131_v10 = vld [vmem:[#allocation6 + $0xc] ss:$16 sps:$4 sm:$0xff]   ;;  %v89_v30 = vpack.c.bf16 %v88_v26, %v88_v26 }
  0x4c   :  { %304 = vmatprep.subr.bf16.mxu0 %v2107_v1  ;;  %v2112_v4 = vld [vmem:[#allocation6 + $0x20] ss:$16 sps:$4 sm:$0xff]   ;;  %v2113_v5 = vld [vmem:[#allocation6 + $0x44] ss:$16 sps:$4 sm:$0xff]   ;;  %v2133_v11 = vld [vmem:[#allocation6 + $0x8] ss:$16 sps:$4 sm:$0xff]   ;;  %345 = vmatprep.subr.bf16.mxu1 %v2131_v10 }
  0x4d   :  { %305 = vmatpush1.bf16.msra.mxu0 %v2109_v2  ;;  %v2115_v6 = vld [vmem:[#allocation6 + $0x40] ss:$16 sps:$4 sm:$0xff]   ;;  %v2116_v7 = vld [vmem:[#allocation6 + $0x64] ss:$16 sps:$4 sm:$0xff]   ;;  %v2134_v12 = vld [vmem:[#allocation6 + $0x2c] ss:$16 sps:$4 sm:$0xff]   ;;  %346 = vmatpush1.bf16.msra.mxu1 %v2133_v11 }
  0x4e   :  { %306 = vmatprep.subr.bf16.mxu0 %v2110_v3  ;;  %v2118_v8 = vld [vmem:[#allocation6 + $0x60] ss:$16 sps:$4 sm:$0xff]   ;;  %v2119_v9 = vld [vmem:[#allocation6 + $0x84] ss:$16 sps:$4 sm:$0xff]   ;;  %v2136_v14 = vld [vmem:[#allocation6 + $0x28] ss:$16 sps:$4 sm:$0xff]   ;;  %347 = vmatprep.subr.bf16.mxu1 %v2134_v12 }
  0x4f   :  { %v2121_v13 = vld [vmem:[#allocation6 + $0x80] ss:$16 sps:$4 sm:$0xff]   ;;  %v2137_v15 = vld [vmem:[#allocation6 + $0x4c] ss:$16 sps:$4 sm:$0xff]   ;;  %v2122_v16 = vld [vmem:[#allocation6 + $0xa4] ss:$16 sps:$4 sm:$0xff]  }
  0x50   :  { %v2124_v17 = vld [vmem:[#allocation6 + $0xa0] ss:$16 sps:$4 sm:$0xff]   ;;  %v2139_v18 = vld [vmem:[#allocation6 + $0x48] ss:$16 sps:$4 sm:$0xff]   ;;  %v2140_v19 = vld [vmem:[#allocation6 + $0x6c] ss:$16 sps:$4 sm:$0xff]  }
  0x51   :  { %307 = vmatpush1.bf16.msra.mxu0 %v2112_v4  ;;  %348 = vmatpush1.bf16.msra.mxu1 %v2136_v14  ;;  %v2125_v20 = vld [vmem:[#allocation6 + $0xc4] ss:$16 sps:$4 sm:$0xff]   ;;  %v2127_v21 = vld [vmem:[#allocation6 + $0xc0] ss:$16 sps:$4 sm:$0xff]   ;;  %v2142_v22 = vld [vmem:[#allocation6 + $0x68] ss:$16 sps:$4 sm:$0xff]  }
  0x52   :  { %308 = vmatprep.subr.bf16.mxu0 %v2113_v5  ;;  %349 = vmatprep.subr.bf16.mxu1 %v2137_v15  ;;  %v2143_v23 = vld [vmem:[#allocation6 + $0x8c] ss:$16 sps:$4 sm:$0xff]   ;;  %v2128_v24 = vld [vmem:[#allocation6 + $0xe4] ss:$16 sps:$4 sm:$0xff]   ;;  %v2130_v25 = vld [vmem:[#allocation6 + $0xe0] ss:$16 sps:$4 sm:$0xff]  }
  0x53   :  { %v2145_v27 = vld [vmem:[#allocation6 + $0x88] ss:$16 sps:$4 sm:$0xff]   ;;  %v2146_v28 = vld [vmem:[#allocation6 + $0xac] ss:$16 sps:$4 sm:$0xff]   ;;  %v2157_v29 = vld [vmem:[#allocation8 + $0x4] ss:$16 sps:$4 sm:$0xff]  }
  0x54   :  { %v2148_v31 = vld [vmem:[#allocation6 + $0xa8] ss:$16 sps:$4 sm:$0xff]   ;;  %v2149_v32 = vld [vmem:[#allocation6 + $0xcc] ss:$16 sps:$4 sm:$0xff]   ;;  %v2155_v33 = vld [vmem:[#allocation8] ss:$16 sps:$4 sm:$0xff]  }
  0x55   :  { %309 = vmatpush1.bf16.msra.mxu0 %v2115_v6  ;;  %350 = vmatpush1.bf16.msra.mxu1 %v2139_v18  ;;  %v2163_v34 = vld [vmem:[#allocation8 + $0x24] ss:$16 sps:$4 sm:$0xff]   ;;  %v2151_v35 = vld [vmem:[#allocation6 + $0xc8] ss:$16 sps:$4 sm:$0xff]   ;;  %v2152_v36 = vld [vmem:[#allocation6 + $0xec] ss:$16 sps:$4 sm:$0xff]  }
  0x56   :  { %310 = vmatprep.subr.bf16.mxu0 %v2116_v7  ;;  %351 = vmatprep.subr.bf16.mxu1 %v2140_v19  ;;  %v2161_v37 = vld [vmem:[#allocation8 + $0x20] ss:$16 sps:$4 sm:$0xff]   ;;  %v2169_v38 = vld [vmem:[#allocation8 + $0x44] ss:$16 sps:$4 sm:$0xff]   ;;  %v2154_v39 = vld [vmem:[#allocation6 + $0xe8] ss:$16 sps:$4 sm:$0xff]  }
  0x57   :  { %v2160_v40 = vld [vmem:[#allocation8 + $0xc] ss:$16 sps:$4 sm:$0xff]   ;;  %v2167_v41 = vld [vmem:[#allocation8 + $0x40] ss:$16 sps:$4 sm:$0xff]   ;;  %v2175_v42 = vld [vmem:[#allocation8 + $0x64] ss:$16 sps:$4 sm:$0xff]  }
  0x58   :  { %v2158_v43 = vld [vmem:[#allocation8 + $0x8] ss:$16 sps:$4 sm:$0xff]   ;;  %v2166_v44 = vld [vmem:[#allocation8 + $0x2c] ss:$16 sps:$4 sm:$0xff]   ;;  %v2173_v45 = vld [vmem:[#allocation8 + $0x60] ss:$16 sps:$4 sm:$0xff]  }
  0x59   :  { %311 = vmatpush1.bf16.msra.mxu0 %v2118_v8  ;;  %352 = vmatpush1.bf16.msra.mxu1 %v2142_v22  ;;  %v2181_v46 = vld [vmem:[#allocation8 + $0x84] ss:$16 sps:$4 sm:$0xff]   ;;  %v2164_v47 = vld [vmem:[#allocation8 + $0x28] ss:$16 sps:$4 sm:$0xff]   ;;  %v2172_v48 = vld [vmem:[#allocation8 + $0x4c] ss:$16 sps:$4 sm:$0xff]  }
  0x5a   :  { %312 = vmatprep.subr.bf16.mxu0 %v2119_v9  ;;  %353 = vmatprep.subr.bf16.mxu1 %v2143_v23  ;;  %v2179_v49 = vld [vmem:[#allocation8 + $0x80] ss:$16 sps:$4 sm:$0xff]   ;;  %v2187_v50 = vld [vmem:[#allocation8 + $0xa4] ss:$16 sps:$4 sm:$0xff]   ;;  %v2170_v51 = vld [vmem:[#allocation8 + $0x48] ss:$16 sps:$4 sm:$0xff]  }
  0x5b   :  { %v2178_v52 = vld [vmem:[#allocation8 + $0x6c] ss:$16 sps:$4 sm:$0xff]   ;;  %v2185_v53 = vld [vmem:[#allocation8 + $0xa0] ss:$16 sps:$4 sm:$0xff]   ;;  %v2193_v54 = vld [vmem:[#allocation8 + $0xc4] ss:$16 sps:$4 sm:$0xff]  }
  0x5c   :  { %v2176_v55 = vld [vmem:[#allocation8 + $0x68] ss:$16 sps:$4 sm:$0xff]   ;;  %v2184_v56 = vld [vmem:[#allocation8 + $0x8c] ss:$16 sps:$4 sm:$0xff]   ;;  %v2191_v57 = vld [vmem:[#allocation8 + $0xc0] ss:$16 sps:$4 sm:$0xff]  }
  0x5d   :  { %313 = vmatpush1.bf16.msra.mxu0 %v2121_v13  ;;  %354 = vmatpush1.bf16.msra.mxu1 %v2145_v27  ;;  %v2199_v58 = vld [vmem:[#allocation8 + $0xe4] ss:$16 sps:$4 sm:$0xff]   ;;  %v2182_v59 = vld [vmem:[#allocation8 + $0x88] ss:$16 sps:$4 sm:$0xff]   ;;  %v2190_v60 = vld [vmem:[#allocation8 + $0xac] ss:$16 sps:$4 sm:$0xff]  }
  0x5e   :  { %314 = vmatprep.subr.bf16.mxu0 %v2122_v16  ;;  %355 = vmatprep.subr.bf16.mxu1 %v2146_v28  ;;  %v2197_v61 = vld [vmem:[#allocation8 + $0xe0] ss:$16 sps:$4 sm:$0xff]   ;;  %v2205_v62 = vld [vmem:[#allocation8 + $0x104] ss:$16 sps:$4 sm:$0xff]   ;;  %v2188_v63 = vld [vmem:[#allocation8 + $0xa8] ss:$16 sps:$4 sm:$0xff]  }
  0x5f   :  { %v2196_v0 = vld [vmem:[#allocation8 + $0xcc] ss:$16 sps:$4 sm:$0xff]   ;;  %v2203_v1 = vld [vmem:[#allocation8 + $0x100] ss:$16 sps:$4 sm:$0xff]   ;;  %v2211_v2 = vld [vmem:[#allocation8 + $0x124] ss:$16 sps:$4 sm:$0xff]  }
  0x60   :  { %v2194_v3 = vld [vmem:[#allocation8 + $0xc8] ss:$16 sps:$4 sm:$0xff]   ;;  %v2202_v4 = vld [vmem:[#allocation8 + $0xec] ss:$16 sps:$4 sm:$0xff]   ;;  %v2209_v5 = vld [vmem:[#allocation8 + $0x120] ss:$16 sps:$4 sm:$0xff]  }
  0x61   :  { %315 = vmatpush1.bf16.msra.mxu0 %v2124_v17  ;;  %356 = vmatpush1.bf16.msra.mxu1 %v2148_v31  ;;  %v2217_v6 = vld [vmem:[#allocation8 + $0x144] ss:$16 sps:$4 sm:$0xff]   ;;  %v2200_v7 = vld [vmem:[#allocation8 + $0xe8] ss:$16 sps:$4 sm:$0xff]   ;;  %v2208_v8 = vld [vmem:[#allocation8 + $0x10c] ss:$16 sps:$4 sm:$0xff]  }
  0x62   :  { %316 = vmatprep.subr.bf16.mxu0 %v2125_v20  ;;  %357 = vmatprep.subr.bf16.mxu1 %v2149_v32  ;;  %v2215_v9 = vld [vmem:[#allocation8 + $0x140] ss:$16 sps:$4 sm:$0xff]   ;;  %v2223_v10 = vld [vmem:[#allocation8 + $0x164] ss:$16 sps:$4 sm:$0xff]   ;;  %v2206_v11 = vld [vmem:[#allocation8 + $0x108] ss:$16 sps:$4 sm:$0xff]  }
  0x63   :  { %v2214_v12 = vld [vmem:[#allocation8 + $0x12c] ss:$16 sps:$4 sm:$0xff]   ;;  %v2221_v13 = vld [vmem:[#allocation8 + $0x160] ss:$16 sps:$4 sm:$0xff]   ;;  %v2229_v14 = vld [vmem:[#allocation8 + $0x184] ss:$16 sps:$4 sm:$0xff]  }
  0x64   :  { %v2212_v15 = vld [vmem:[#allocation8 + $0x128] ss:$16 sps:$4 sm:$0xff]   ;;  %v2220_v16 = vld [vmem:[#allocation8 + $0x14c] ss:$16 sps:$4 sm:$0xff]   ;;  %v2227_v17 = vld [vmem:[#allocation8 + $0x180] ss:$16 sps:$4 sm:$0xff]  }
  0x65   :  { %317 = vmatpush1.bf16.msra.mxu0 %v2127_v21  ;;  %358 = vmatpush1.bf16.msra.mxu1 %v2151_v35  ;;  %v2235_v18 = vld [vmem:[#allocation8 + $0x1a4] ss:$16 sps:$4 sm:$0xff]   ;;  %v2218_v19 = vld [vmem:[#allocation8 + $0x148] ss:$16 sps:$4 sm:$0xff]   ;;  %v2226_v20 = vld [vmem:[#allocation8 + $0x16c] ss:$16 sps:$4 sm:$0xff]  }
  0x66   :  { %318 = vmatprep.subr.bf16.mxu0 %v2128_v24  ;;  %359 = vmatprep.subr.bf16.mxu1 %v2152_v36  ;;  %v2233_v21 = vld [vmem:[#allocation8 + $0x1a0] ss:$16 sps:$4 sm:$0xff]   ;;  %v2224_v22 = vld [vmem:[#allocation8 + $0x168] ss:$16 sps:$4 sm:$0xff]   ;;  %v2232_v23 = vld [vmem:[#allocation8 + $0x18c] ss:$16 sps:$4 sm:$0xff]  }
  0x67   :  { %v2230_v24 = vld [vmem:[#allocation8 + $0x188] ss:$16 sps:$4 sm:$0xff]   ;;  %v2241_v27 = vld [vmem:[#allocation8 + $0x1c4] ss:$16 sps:$4 sm:$0xff]   ;;  %v2244_v28 = vld [vmem:[#allocation8 + $0x1cc] ss:$16 sps:$4 sm:$0xff]  }
  0x68   :  { %v2236_v26 = vld [vmem:[#allocation8 + $0x1a8] ss:$16 sps:$4 sm:$0xff]   ;;  %v2247_v31 = vld [vmem:[#allocation8 + $0x1e4] ss:$16 sps:$4 sm:$0xff]   ;;  %v2250_v32 = vld [vmem:[#allocation8 + $0x1ec] ss:$16 sps:$4 sm:$0xff]  }
  0x69   :  { %319 = vmatpush1.bf16.msra.mxu0 %v2130_v25  ;;  %360 = vmatpush1.bf16.msra.mxu1 %v2154_v39  ;;  %v2238_v25 = vld [vmem:[#allocation8 + $0x1ac] ss:$16 sps:$4 sm:$0xff]   ;;  %v2253_v35 = vld [vmem:[#allocation8 + $0x204] ss:$16 sps:$4 sm:$0xff]   ;;  %s2574_s23 = smov [#allocation11]  }
  0x6a   :  { %1184 = vmatprep.subr.bf16.mxu0 %v2157_v29  ;;  %1266 = vmatprep.subr.bf16.mxu1 %v2160_v40  ;;  %v2239_v29 = vld [vmem:[#allocation8 + $0x1c0] ss:$16 sps:$4 sm:$0xff]   ;;  %v2256_v36 = vld [vmem:[#allocation8 + $0x20c] ss:$16 sps:$4 sm:$0xff]   ;;  %v2687_v40 = vld [vmem:[%s2741_s2] sm:$0xf] }
  0x6b   :  { %s1850_s25 = sshll.u32 %s2574_s23, 4  ;;  %s1851_s25 = int_to_ptr.vmem [resolvable:$true] %s1850_s25 }
  0x6c   :  { %337 = vmatmul.mubr.bf16.vlgmr.msra.gmra.mrb[0].mxu0 %v89_v30  ;;  %378 = vmatmul.mubr.bf16.vlgmr.msra.gmra.mrb[0].mxu1 %v89_v30  ;;  %v2242_v30 = vld [vmem:[#allocation8 + $0x1c8] ss:$16 sps:$4 sm:$0xff]   ;;  %s2535_s0 = scalar_lea.vmem %s1851_s25, 128  ;;  %p2540_p5 = scmp.lt.s32.totalorder %s1851_s25, %s1851_s25 }
  0x6d   :  { %1185 = vmatpush1.bf16.msra.mxu0 %v2155_v33  ;;  %1267 = vmatpush1.bf16.msra.mxu1 %v2158_v43  ;;  %v2245_v33 = vld [vmem:[#allocation8 + $0x1e0] ss:$16 sps:$4 sm:$0xff]   ;;  %p2536_p4 = scmp.ne.s32.totalorder %s1851_s25, %s2535_s0  ;;  %p2541_p6 = scmp.lt.s32.totalorder %s2535_s0, %s2535_s0 }
  0x6e   :  { %1186 = vmatprep.subr.bf16.mxu0 %v2163_v34  ;;  %1268 = vmatprep.subr.bf16.mxu1 %v2166_v44  ;;  %v2248_v34 = vld [vmem:[#allocation8 + $0x1e8] ss:$16 sps:$4 sm:$0xff]  }
  0x6f   :  { %p2542_p7 = por %p2541_p6, %p2540_p5 }
  0x71   :  { %1187 = vmatpush1.bf16.msra.mxu0 %v2161_v37  ;;  %1269 = vmatpush1.bf16.msra.mxu1 %v2164_v47  ;;  %v124_v37 = vlaneseq  ;;  %p2543_p8 = pnand %p2542_p7, %p2536_p4 }
  0x72   :  { %1188 = vmatprep.subr.bf16.mxu0 %v2169_v38  ;;  %1270 = vmatprep.subr.bf16.mxu1 %v2172_v48 }
  0x73   :  { %v2679_v38 = vshrl.u32 %v124_v37, 7  ;;  %v2313_v37 = vld [vmem:[#allocation8 + $0x344] ss:$16 sps:$4 sm:$0xff]  }
  0x75   :  { %1189 = vmatpush1.bf16.msra.mxu0 %v2167_v41  ;;  %1271 = vmatpush1.bf16.msra.mxu1 %v2170_v51  ;;  %v2682_v39 = vsub.s32 0, %v2679_v38  ;;  %v2690_v41 = vsub.s32 1, %v2679_v38 }
  0x76   :  { %1190 = vmatprep.subr.bf16.mxu0 %v2175_v42  ;;  %1272 = vmatprep.subr.bf16.mxu1 %v2178_v52  ;;  %v138_v52 = vsub.s32 3, %v2679_v38 }
  0x77   :  { %v127_v42 = vrot.slane %v2687_v40, %v2682_v39  ;;  %v131_v43 = vrot.slane %v2687_v40, %v2690_v41 }
  0x79   :  { %1191 = vmatpush1.bf16.msra.mxu0 %v2173_v45  ;;  %1273 = vmatpush1.bf16.msra.mxu1 %v2176_v55  ;;  %v2254_v55 = vld [vmem:[#allocation8 + $0x208] ss:$16 sps:$4 sm:$0xff]  }
  0x7a   :  { %1192 = vmatprep.subr.bf16.mxu0 %v2181_v46  ;;  %1274 = vmatprep.subr.bf16.mxu1 %v2184_v56 }
  0x7d   :  { %1193 = vmatpush1.bf16.msra.mxu0 %v2179_v49  ;;  %1275 = vmatpush1.bf16.msra.mxu1 %v2182_v59  ;;  %v139_v59 = vrot.slane %v2687_v40, %v138_v52 }
  0x7e   :  { %1194 = vmatprep.subr.bf16.mxu0 %v2187_v50  ;;  %1276 = vmatprep.subr.bf16.mxu1 %v2190_v60  ;;  %v2257_v60 = vld [vmem:[#allocation8 + $0x220] ss:$16 sps:$4 sm:$0xff]  }
  0x81   :  { %1195 = vmatpush1.bf16.msra.mxu0 %v2185_v53  ;;  %1277 = vmatpush1.bf16.msra.mxu1 %v2188_v63  ;;  %v2268_v63 = vld [vmem:[#allocation8 + $0x24c] ss:$16 sps:$4 sm:$0xff]  }
  0x82   :  { %1196 = vmatprep.subr.bf16.mxu0 %v2193_v54  ;;  %1278 = vmatprep.subr.bf16.mxu1 %v2196_v0  ;;  %v2251_v54 = vld [vmem:[#allocation8 + $0x200] ss:$16 sps:$4 sm:$0xff]  }
  0x85   :  { %1197 = vmatpush1.bf16.msra.mxu0 %v2191_v57  ;;  %1279 = vmatpush1.bf16.msra.mxu1 %v2194_v3  ;;  %v2259_v57 = vld [vmem:[#allocation8 + $0x224] ss:$16 sps:$4 sm:$0xff]  }
  0x86   :  { %1198 = vmatprep.subr.bf16.mxu0 %v2199_v58  ;;  %1280 = vmatprep.subr.bf16.mxu1 %v2202_v4  ;;  %v2262_v58 = vld [vmem:[#allocation8 + $0x22c] ss:$16 sps:$4 sm:$0xff]   ;;  %v2263_v4 = vld [vmem:[#allocation8 + $0x240] ss:$16 sps:$4 sm:$0xff]  }
  0x89   :  { %1199 = vmatpush1.bf16.msra.mxu0 %v2197_v61  ;;  %1281 = vmatpush1.bf16.msra.mxu1 %v2200_v7  ;;  %v2260_v61 = vld [vmem:[#allocation8 + $0x228] ss:$16 sps:$4 sm:$0xff]   ;;  %v2271_v7 = vld [vmem:[#allocation8 + $0x264] ss:$16 sps:$4 sm:$0xff]  }
  0x8a   :  { %1200 = vmatprep.subr.bf16.mxu0 %v2205_v62  ;;  %1282 = vmatprep.subr.bf16.mxu1 %v2208_v8  ;;  %v2265_v62 = vld [vmem:[#allocation8 + $0x244] ss:$16 sps:$4 sm:$0xff]   ;;  %v2274_v8 = vld [vmem:[#allocation8 + $0x26c] ss:$16 sps:$4 sm:$0xff]  }
  0x8d   :  { %1201 = vmatpush1.bf16.msra.mxu0 %v2203_v1  ;;  %1283 = vmatpush1.bf16.msra.mxu1 %v2206_v11  ;;  %v2269_v11 = vld [vmem:[#allocation8 + $0x260] ss:$16 sps:$4 sm:$0xff]  }
  0x8e   :  { %1202 = vmatprep.subr.bf16.mxu0 %v2211_v2  ;;  %1284 = vmatprep.subr.bf16.mxu1 %v2214_v12  ;;  %v2272_v12 = vld [vmem:[#allocation8 + $0x268] ss:$16 sps:$4 sm:$0xff]  }
  0x91   :  { %1203 = vmatpush1.bf16.msra.mxu0 %v2209_v5  ;;  %1285 = vmatpush1.bf16.msra.mxu1 %v2212_v15  ;;  %v2266_v5 = vld [vmem:[#allocation8 + $0x248] ss:$16 sps:$4 sm:$0xff]   ;;  %v2275_v15 = vld [vmem:[#allocation8 + $0x280] ss:$16 sps:$4 sm:$0xff]  }
  0x92   :  { %1204 = vmatprep.subr.bf16.mxu0 %v2217_v6  ;;  %1286 = vmatprep.subr.bf16.mxu1 %v2220_v16  ;;  %v2278_v16 = vld [vmem:[#allocation8 + $0x288] ss:$16 sps:$4 sm:$0xff]  }
  0x95   :  { %1205 = vmatpush1.bf16.msra.mxu0 %v2215_v9  ;;  %1287 = vmatpush1.bf16.msra.mxu1 %v2218_v19  ;;  %v2281_v19 = vld [vmem:[#allocation8 + $0x2a0] ss:$16 sps:$4 sm:$0xff]  }
  0x96   :  { %1206 = vmatprep.subr.bf16.mxu0 %v2223_v10  ;;  %1288 = vmatprep.subr.bf16.mxu1 %v2226_v20  ;;  %v2284_v20 = vld [vmem:[#allocation8 + $0x2a8] ss:$16 sps:$4 sm:$0xff]  }
  0x99   :  { %1207 = vmatpush1.bf16.msra.mxu0 %v2221_v13  ;;  %1289 = vmatpush1.bf16.msra.mxu1 %v2224_v22  ;;  %v2277_v13 = vld [vmem:[#allocation8 + $0x284] ss:$16 sps:$4 sm:$0xff]   ;;  %v2292_v22 = vld [vmem:[#allocation8 + $0x2cc] ss:$16 sps:$4 sm:$0xff]  }
  0x9a   :  { %1208 = vmatprep.subr.bf16.mxu0 %v2229_v14  ;;  %1290 = vmatprep.subr.bf16.mxu1 %v2232_v23  ;;  %v2280_v14 = vld [vmem:[#allocation8 + $0x28c] ss:$16 sps:$4 sm:$0xff]   ;;  %v2287_v23 = vld [vmem:[#allocation8 + $0x2c0] ss:$16 sps:$4 sm:$0xff]  }
  0x9d   :  { %1209 = vmatpush1.bf16.msra.mxu0 %v2227_v17  ;;  %1291 = vmatpush1.bf16.msra.mxu1 %v2230_v24  ;;  %v2283_v17 = vld [vmem:[#allocation8 + $0x2a4] ss:$16 sps:$4 sm:$0xff]   ;;  %v2290_v24 = vld [vmem:[#allocation8 + $0x2c8] ss:$16 sps:$4 sm:$0xff]  }
  0x9e   :  { %1210 = vmatprep.subr.bf16.mxu0 %v2235_v18  ;;  %1292 = vmatprep.subr.bf16.mxu1 %v2238_v25  ;;  %v2286_v18 = vld [vmem:[#allocation8 + $0x2ac] ss:$16 sps:$4 sm:$0xff]   ;;  %v2295_v25 = vld [vmem:[#allocation8 + $0x2e4] ss:$16 sps:$4 sm:$0xff]  }
  0xa1   :  { %1211 = vmatpush1.bf16.msra.mxu0 %v2233_v21  ;;  %1293 = vmatpush1.bf16.msra.mxu1 %v2236_v26  ;;  %v2289_v21 = vld [vmem:[#allocation8 + $0x2c4] ss:$16 sps:$4 sm:$0xff]   ;;  %v2298_v26 = vld [vmem:[#allocation8 + $0x2ec] ss:$16 sps:$4 sm:$0xff]  }
  0xa2   :  { %1212 = vmatprep.subr.bf16.mxu0 %v2241_v27  ;;  %1294 = vmatprep.subr.bf16.mxu1 %v2244_v28  ;;  %v2293_v27 = vld [vmem:[#allocation8 + $0x2e0] ss:$16 sps:$4 sm:$0xff]   ;;  %v2296_v28 = vld [vmem:[#allocation8 + $0x2e8] ss:$16 sps:$4 sm:$0xff]  }
  0xa5   :  { %1213 = vmatpush1.bf16.msra.mxu0 %v2239_v29  ;;  %1295 = vmatpush1.bf16.msra.mxu1 %v2242_v30  ;;  %v2301_v29 = vld [vmem:[#allocation8 + $0x304] ss:$16 sps:$4 sm:$0xff]   ;;  %v2304_v30 = vld [vmem:[#allocation8 + $0x30c] ss:$16 sps:$4 sm:$0xff]  }
  0xa6   :  { %1214 = vmatprep.subr.bf16.mxu0 %v2247_v31  ;;  %1296 = vmatprep.subr.bf16.mxu1 %v2250_v32  ;;  %v2299_v31 = vld [vmem:[#allocation8 + $0x300] ss:$16 sps:$4 sm:$0xff]   ;;  %v2302_v32 = vld [vmem:[#allocation8 + $0x308] ss:$16 sps:$4 sm:$0xff]  }
  0xa9   :  { %1215 = vmatpush1.bf16.msra.mxu0 %v2245_v33  ;;  %1297 = vmatpush1.bf16.msra.mxu1 %v2248_v34  ;;  %v2307_v33 = vld [vmem:[#allocation8 + $0x324] ss:$16 sps:$4 sm:$0xff]   ;;  %v2310_v34 = vld [vmem:[#allocation8 + $0x32c] ss:$16 sps:$4 sm:$0xff]  }
  0xaa   :  { %1225 = vmatprep.subr.bf16.mxu0 %v2253_v35  ;;  %1307 = vmatprep.subr.bf16.mxu1 %v2256_v36  ;;  %v2305_v35 = vld [vmem:[#allocation8 + $0x320] ss:$16 sps:$4 sm:$0xff]   ;;  %v2308_v36 = vld [vmem:[#allocation8 + $0x328] ss:$16 sps:$4 sm:$0xff]  }
 0x13f   :  { %v338_v44 = vpop.f32.mrb[0].mxu0  ;;  %v2700_v0 = vpop.f32.mrb[0].mxu1 }
 0x140   :  { %v339_v45 = vadd.f32 %v338_v44, %v127_v42  ;;  %v340_v46 = vpop.f32.mrb[1].mxu0  ;;  %v381_v1 = vpop.f32.mrb[1].mxu1  ;;  %v2316_v42 = vld [vmem:[#allocation8 + $0x34c] ss:$16 sps:$4 sm:$0xff]   ;;  %v2314_v44 = vld [vmem:[#allocation8 + $0x348] ss:$16 sps:$4 sm:$0xff]  }
 0x141   :  { %v341_v47 = vadd.f32 %v340_v46, %v131_v43  ;;  %v342_v48 = vpop.f32.mrb[2].mxu0  ;;  %v382_v2 = vadd.f32 %v381_v1, %v139_v59  ;;  %v383_v3 = vpop.f32.mrb[2].mxu1  ;;  %v2311_v43 = vld [vmem:[#allocation8 + $0x340] ss:$16 sps:$4 sm:$0xff]   ;;  %v2322_v46 = vld [vmem:[#allocation8 + $0x36c] ss:$16 sps:$4 sm:$0xff]  }
 0x142   :  { %v386_v49 = vmax.f32 %v339_v45, 0.0  ;;  %v343_v50 = vpop.f32.mrb[3].mxu0  ;;  %v384_v6 = vpop.f32.mrb[3].mxu1  ;;  %v2319_v45 = vld [vmem:[#allocation8 + $0x364] ss:$16 sps:$4 sm:$0xff]  }
 0x143   :  { %v387_v51 = vmax.f32 %v341_v47, 0.0  ;;  %v389_v9 = vmax.f32 %v382_v2, 0.0  ;;  %v2317_v47 = vld [vmem:[#allocation8 + $0x360] ss:$16 sps:$4 sm:$0xff]   ;;  %v2320_v48 = vld [vmem:[#allocation8 + $0x368] ss:$16 sps:$4 sm:$0xff]  }
 0x144   :  { %v390_v56 = vpack.c.bf16 %v386_v49, %v386_v49  ;;  %v2325_v49 = vld [vmem:[#allocation8 + $0x384] ss:$16 sps:$4 sm:$0xff]   ;;  %v2328_v50 = vld [vmem:[#allocation8 + $0x38c] ss:$16 sps:$4 sm:$0xff]  }
 0x145   :  { %v391_v53 = vpack.c.bf16 %v387_v51, %v387_v51  ;;  %v393_v10 = vpack.c.bf16 %v389_v9, %v389_v9  ;;  %v2323_v51 = vld [vmem:[#allocation8 + $0x380] ss:$16 sps:$4 sm:$0xff]   ;;  %v2343_v2 = vld [vmem:[#allocation8 + $0x3e4] ss:$16 sps:$4 sm:$0xff]   ;;  %v2346_v3 = vld [vmem:[#allocation8 + $0x3ec] ss:$16 sps:$4 sm:$0xff]  }
 0x146   :  { %v2350_v9 = vld [vmem:[#allocation9 + $0x100] ss:$8 sps:$4 sm:$0xff]  }
 0x147   :  { %1216 = vmatprep.mubr.bf16.mxu0 %v391_v53  ;;  %1298 = vmatprep.mubr.bf16.mxu1 %v391_v53  ;;  %v2326_v53 = vld [vmem:[#allocation8 + $0x388] ss:$16 sps:$4 sm:$0xff]  }
 0x148   :  { %1217 = vmatmul.mubr.bf16.vlgmr.msra.gmra.mrb[4].mxu0 %v390_v56  ;;  %1299 = vmatmul.mubr.bf16.vlgmr.msra.gmra.mrb[4].mxu1 %v390_v56  ;;  %v2334_v56 = vld [vmem:[#allocation8 + $0x3ac] ss:$16 sps:$4 sm:$0xff]  }
 0x149   :  { %1226 = vmatpush1.bf16.msra.mxu0 %v2251_v54  ;;  %1308 = vmatpush1.bf16.msra.mxu1 %v2254_v55  ;;  %v134_v54 = vsub.s32 2, %v2679_v38  ;;  %v2331_v55 = vld [vmem:[#allocation8 + $0x3a4] ss:$16 sps:$4 sm:$0xff]  }
 0x14a   :  { %1227 = vmatprep.subr.bf16.mxu0 %v2259_v57  ;;  %1309 = vmatprep.subr.bf16.mxu1 %v2262_v58  ;;  %v2329_v57 = vld [vmem:[#allocation8 + $0x3a0] ss:$16 sps:$4 sm:$0xff]   ;;  %v2332_v58 = vld [vmem:[#allocation8 + $0x3a8] ss:$16 sps:$4 sm:$0xff]  }
 0x14b   :  { %1257 = vmatprep.mubr.bf16.mxu0 %v393_v10  ;;  %1339 = vmatprep.mubr.bf16.mxu1 %v393_v10  ;;  %v135_v59 = vrot.slane %v2687_v40, %v134_v54  ;;  %v2349_v40 = vld [vmem:[#allocation9 + $0x4] ss:$8 sps:$4 sm:$0xff]  }
 0x14d   :  { %1228 = vmatpush1.bf16.msra.mxu0 %v2257_v60  ;;  %1310 = vmatpush1.bf16.msra.mxu1 %v2260_v61  ;;  %v2337_v60 = vld [vmem:[#allocation8 + $0x3c4] ss:$16 sps:$4 sm:$0xff]   ;;  %v2340_v61 = vld [vmem:[#allocation8 + $0x3cc] ss:$16 sps:$4 sm:$0xff]   ;;  %v380_v1 = vadd.f32 %v2700_v0, %v135_v59  ;;  %v2416_v59 = vld [vmem:[#allocation9 + $0x1b0] ss:$8 sps:$4 sm:$0xff]  }
 0x14e   :  { %1229 = vmatprep.subr.bf16.mxu0 %v2265_v62  ;;  %1311 = vmatprep.subr.bf16.mxu1 %v2268_v63  ;;  %v2335_v62 = vld [vmem:[#allocation8 + $0x3c0] ss:$16 sps:$4 sm:$0xff]   ;;  %v2338_v63 = vld [vmem:[#allocation8 + $0x3c8] ss:$16 sps:$4 sm:$0xff]   ;;  %v2355_v0 = vld [vmem:[#allocation9 + $0x14] ss:$8 sps:$4 sm:$0xff]  }
 0x14f   :  { %v388_v6 = vmax.f32 %v380_v1, 0.0  ;;  %v2427_v1 = vld [vmem:[#allocation9 + $0xd4] ss:$8 sps:$4 sm:$0xff]  }
 0x151   :  { %1230 = vmatpush1.bf16.msra.mxu0 %v2263_v4  ;;  %1312 = vmatpush1.bf16.msra.mxu1 %v2266_v5  ;;  %v2341_v4 = vld [vmem:[#allocation8 + $0x3e0] ss:$16 sps:$4 sm:$0xff]   ;;  %v2344_v5 = vld [vmem:[#allocation8 + $0x3e8] ss:$16 sps:$4 sm:$0xff]   ;;  %v392_v10 = vpack.c.bf16 %v388_v6, %v388_v6  ;;  %v2436_v6 = vld [vmem:[#allocation9 + $0x1e4] ss:$8 sps:$4 sm:$0xff]  }
 0x152   :  { %1231 = vmatprep.subr.bf16.mxu0 %v2271_v7  ;;  %1313 = vmatprep.subr.bf16.mxu1 %v2274_v8  ;;  %v2352_v7 = vld [vmem:[#allocation9 + $0x104] ss:$8 sps:$4 sm:$0xff]   ;;  %v2347_v8 = vld [vmem:[#allocation9] ss:$8 sps:$4 sm:$0xff]  }
 0x155   :  { %1232 = vmatpush1.bf16.msra.mxu0 %v2269_v11  ;;  %1314 = vmatpush1.bf16.msra.mxu1 %v2272_v12  ;;  %v2358_v11 = vld [vmem:[#allocation9 + $0x114] ss:$8 sps:$4 sm:$0xff]   ;;  %v2353_v12 = vld [vmem:[#allocation9 + $0x10] ss:$8 sps:$4 sm:$0xff]  }
 0x156   :  { %1233 = vmatprep.subr.bf16.mxu0 %v2277_v13  ;;  %1315 = vmatprep.subr.bf16.mxu1 %v2280_v14  ;;  %v2356_v13 = vld [vmem:[#allocation9 + $0x110] ss:$8 sps:$4 sm:$0xff]   ;;  %v2361_v14 = vld [vmem:[#allocation9 + $0x24] ss:$8 sps:$4 sm:$0xff]  }
 0x159   :  { %1234 = vmatpush1.bf16.msra.mxu0 %v2275_v15  ;;  %1316 = vmatpush1.bf16.msra.mxu1 %v2278_v16  ;;  %v2364_v15 = vld [vmem:[#allocation9 + $0x124] ss:$8 sps:$4 sm:$0xff]   ;;  %v2359_v16 = vld [vmem:[#allocation9 + $0x20] ss:$8 sps:$4 sm:$0xff]  }
 0x15a   :  { %1235 = vmatprep.subr.bf16.mxu0 %v2283_v17  ;;  %1317 = vmatprep.subr.bf16.mxu1 %v2286_v18  ;;  %v2362_v17 = vld [vmem:[#allocation9 + $0x120] ss:$8 sps:$4 sm:$0xff]   ;;  %v2367_v18 = vld [vmem:[#allocation9 + $0x34] ss:$8 sps:$4 sm:$0xff]  }
 0x15d   :  { %1236 = vmatpush1.bf16.msra.mxu0 %v2281_v19  ;;  %1318 = vmatpush1.bf16.msra.mxu1 %v2284_v20  ;;  %v2370_v19 = vld [vmem:[#allocation9 + $0x134] ss:$8 sps:$4 sm:$0xff]   ;;  %v2365_v20 = vld [vmem:[#allocation9 + $0x30] ss:$8 sps:$4 sm:$0xff]  }
 0x15e   :  { %1237 = vmatprep.subr.bf16.mxu0 %v2289_v21  ;;  %1319 = vmatprep.subr.bf16.mxu1 %v2292_v22  ;;  %v2368_v21 = vld [vmem:[#allocation9 + $0x130] ss:$8 sps:$4 sm:$0xff]   ;;  %v2373_v22 = vld [vmem:[#allocation9 + $0x44] ss:$8 sps:$4 sm:$0xff]  }
 0x161   :  { %1238 = vmatpush1.bf16.msra.mxu0 %v2287_v23  ;;  %1320 = vmatpush1.bf16.msra.mxu1 %v2290_v24  ;;  %v2376_v23 = vld [vmem:[#allocation9 + $0x144] ss:$8 sps:$4 sm:$0xff]   ;;  %v2371_v24 = vld [vmem:[#allocation9 + $0x40] ss:$8 sps:$4 sm:$0xff]  }
 0x162   :  { %1239 = vmatprep.subr.bf16.mxu0 %v2295_v25  ;;  %1321 = vmatprep.subr.bf16.mxu1 %v2298_v26  ;;  %v2374_v25 = vld [vmem:[#allocation9 + $0x140] ss:$8 sps:$4 sm:$0xff]   ;;  %v2379_v26 = vld [vmem:[#allocation9 + $0x54] ss:$8 sps:$4 sm:$0xff]  }
 0x165   :  { %1240 = vmatpush1.bf16.msra.mxu0 %v2293_v27  ;;  %1322 = vmatpush1.bf16.msra.mxu1 %v2296_v28  ;;  %v2382_v27 = vld [vmem:[#allocation9 + $0x154] ss:$8 sps:$4 sm:$0xff]   ;;  %v2377_v28 = vld [vmem:[#allocation9 + $0x50] ss:$8 sps:$4 sm:$0xff]  }
 0x166   :  { %1241 = vmatprep.subr.bf16.mxu0 %v2301_v29  ;;  %1323 = vmatprep.subr.bf16.mxu1 %v2304_v30  ;;  %v2380_v29 = vld [vmem:[#allocation9 + $0x150] ss:$8 sps:$4 sm:$0xff]   ;;  %v2385_v30 = vld [vmem:[#allocation9 + $0x64] ss:$8 sps:$4 sm:$0xff]  }
 0x169   :  { %1242 = vmatpush1.bf16.msra.mxu0 %v2299_v31  ;;  %1324 = vmatpush1.bf16.msra.mxu1 %v2302_v32  ;;  %v2388_v31 = vld [vmem:[#allocation9 + $0x164] ss:$8 sps:$4 sm:$0xff]   ;;  %v2383_v32 = vld [vmem:[#allocation9 + $0x60] ss:$8 sps:$4 sm:$0xff]  }
 0x16a   :  { %1243 = vmatprep.subr.bf16.mxu0 %v2307_v33  ;;  %1325 = vmatprep.subr.bf16.mxu1 %v2310_v34  ;;  %v2386_v33 = vld [vmem:[#allocation9 + $0x160] ss:$8 sps:$4 sm:$0xff]   ;;  %v2391_v34 = vld [vmem:[#allocation9 + $0x74] ss:$8 sps:$4 sm:$0xff]  }
 0x16d   :  { %1244 = vmatpush1.bf16.msra.mxu0 %v2305_v35  ;;  %1326 = vmatpush1.bf16.msra.mxu1 %v2308_v36  ;;  %v2394_v35 = vld [vmem:[#allocation9 + $0x174] ss:$8 sps:$4 sm:$0xff]   ;;  %v2389_v36 = vld [vmem:[#allocation9 + $0x70] ss:$8 sps:$4 sm:$0xff]  }
 0x16e   :  { %1245 = vmatprep.subr.bf16.mxu0 %v2313_v37  ;;  %1327 = vmatprep.subr.bf16.mxu1 %v2316_v42  ;;  %v2392_v37 = vld [vmem:[#allocation9 + $0x170] ss:$8 sps:$4 sm:$0xff]   ;;  %v2397_v42 = vld [vmem:[#allocation9 + $0x84] ss:$8 sps:$4 sm:$0xff]  }
 0x171   :  { %1246 = vmatpush1.bf16.msra.mxu0 %v2311_v43  ;;  %1328 = vmatpush1.bf16.msra.mxu1 %v2314_v44  ;;  %v2400_v43 = vld [vmem:[#allocation9 + $0x184] ss:$8 sps:$4 sm:$0xff]   ;;  %v2395_v44 = vld [vmem:[#allocation9 + $0x80] ss:$8 sps:$4 sm:$0xff]  }
 0x172   :  { %1247 = vmatprep.subr.bf16.mxu0 %v2319_v45  ;;  %1329 = vmatprep.subr.bf16.mxu1 %v2322_v46  ;;  %v2398_v45 = vld [vmem:[#allocation9 + $0x180] ss:$8 sps:$4 sm:$0xff]   ;;  %v2403_v46 = vld [vmem:[#allocation9 + $0x94] ss:$8 sps:$4 sm:$0xff]  }
 0x175   :  { %1248 = vmatpush1.bf16.msra.mxu0 %v2317_v47  ;;  %1330 = vmatpush1.bf16.msra.mxu1 %v2320_v48  ;;  %v2406_v47 = vld [vmem:[#allocation9 + $0x194] ss:$8 sps:$4 sm:$0xff]   ;;  %v2401_v48 = vld [vmem:[#allocation9 + $0x90] ss:$8 sps:$4 sm:$0xff]  }
 0x176   :  { %1249 = vmatprep.subr.bf16.mxu0 %v2325_v49  ;;  %1331 = vmatprep.subr.bf16.mxu1 %v2328_v50  ;;  %v2404_v49 = vld [vmem:[#allocation9 + $0x190] ss:$8 sps:$4 sm:$0xff]   ;;  %v2409_v50 = vld [vmem:[#allocation9 + $0xa4] ss:$8 sps:$4 sm:$0xff]  }
 0x179   :  { %1250 = vmatpush1.bf16.msra.mxu0 %v2323_v51  ;;  %1332 = vmatpush1.bf16.msra.mxu1 %v2326_v53  ;;  %v2412_v51 = vld [vmem:[#allocation9 + $0x1a4] ss:$8 sps:$4 sm:$0xff]   ;;  %v2407_v53 = vld [vmem:[#allocation9 + $0xa0] ss:$8 sps:$4 sm:$0xff]  }
 0x17a   :  { %1251 = vmatprep.subr.bf16.mxu0 %v2331_v55  ;;  %1333 = vmatprep.subr.bf16.mxu1 %v2334_v56  ;;  %v2410_v55 = vld [vmem:[#allocation9 + $0x1a0] ss:$8 sps:$4 sm:$0xff]   ;;  %v2415_v56 = vld [vmem:[#allocation9 + $0xb4] ss:$8 sps:$4 sm:$0xff]  }
 0x17d   :  { %1252 = vmatpush1.bf16.msra.mxu0 %v2329_v57  ;;  %1334 = vmatpush1.bf16.msra.mxu1 %v2332_v58  ;;  %v2418_v57 = vld [vmem:[#allocation9 + $0x1b4] ss:$8 sps:$4 sm:$0xff]   ;;  %v2413_v58 = vld [vmem:[#allocation9 + $0xb0] ss:$8 sps:$4 sm:$0xff]  }
 0x17e   :  { %1253 = vmatprep.subr.bf16.mxu0 %v2337_v60  ;;  %1335 = vmatprep.subr.bf16.mxu1 %v2340_v61  ;;  %v2421_v60 = vld [vmem:[#allocation9 + $0xc4] ss:$8 sps:$4 sm:$0xff]  }
 0x17f   :  { %v2424_v61 = vld [vmem:[#allocation9 + $0x1c4] ss:$8 sps:$4 sm:$0xff]  }
 0x181   :  { %1254 = vmatpush1.bf16.msra.mxu0 %v2335_v62  ;;  %1336 = vmatpush1.bf16.msra.mxu1 %v2338_v63  ;;  %v2419_v62 = vld [vmem:[#allocation9 + $0xc0] ss:$8 sps:$4 sm:$0xff]  }
 0x182   :  { %1255 = vmatprep.subr.bf16.mxu0 %v2343_v2  ;;  %1337 = vmatprep.subr.bf16.mxu1 %v2346_v3  ;;  %v2422_v63 = vld [vmem:[#allocation9 + $0x1c0] ss:$8 sps:$4 sm:$0xff]   ;;  %v2430_v2 = vld [vmem:[#allocation9 + $0x1d4] ss:$8 sps:$4 sm:$0xff]   ;;  %v2425_v3 = vld [vmem:[#allocation9 + $0xd0] ss:$8 sps:$4 sm:$0xff]  }
 0x185   :  { %1256 = vmatpush1.bf16.msra.mxu0 %v2341_v4  ;;  %1338 = vmatpush1.bf16.msra.mxu1 %v2344_v5  ;;  %v2428_v4 = vld [vmem:[#allocation9 + $0x1d0] ss:$8 sps:$4 sm:$0xff]   ;;  %v2433_v5 = vld [vmem:[#allocation9 + $0xe4] ss:$8 sps:$4 sm:$0xff]  }
 0x186   :  { %1752 = vmatprep.subr.bf16.mxu0 %v2349_v40  ;;  %1793 = vmatprep.subr.bf16.mxu1 %v2352_v7  ;;  %v2431_v40 = vld [vmem:[#allocation9 + $0xe0] ss:$8 sps:$4 sm:$0xff]  }
 0x187   :  { %v2434_v7 = vld [vmem:[#allocation9 + $0x1e0] ss:$8 sps:$4 sm:$0xff]  }
 0x188   :  { %1258 = vmatmul.mubr.bf16.vlgmr.msra.gmra.mrb[4].mxu0 %v392_v10  ;;  %1340 = vmatmul.mubr.bf16.vlgmr.msra.gmra.mrb[4].mxu1 %v392_v10  ;;  %v2437_v10 = vld [vmem:[#allocation9 + $0xf0] ss:$8 sps:$4 sm:$0xff]  }
 0x189   :  { %1753 = vmatpush1.bf16.msra.mxu0 %v2347_v8  ;;  %1794 = vmatpush1.bf16.msra.mxu1 %v2350_v9  ;;  %v2439_v8 = vld [vmem:[#allocation9 + $0xf4] ss:$8 sps:$4 sm:$0xff]  }
 0x18a   :  { %1754 = vmatprep.subr.bf16.mxu0 %v2355_v0  ;;  %1795 = vmatprep.subr.bf16.mxu1 %v2358_v11  ;;  %v2442_v9 = vld [vmem:[#allocation9 + $0x1f4] ss:$8 sps:$4 sm:$0xff]   ;;  %v2440_v0 = vld [vmem:[#allocation9 + $0x1f0] ss:$8 sps:$4 sm:$0xff]  }
 0x18b   :  { %v522_v11 = vld [vmem:[%s2743_s4] sm:$0xf] }
 0x18d   :  { %1755 = vmatpush1.bf16.msra.mxu0 %v2353_v12  ;;  %1796 = vmatpush1.bf16.msra.mxu1 %v2356_v13  ;;  %v527_v12 = vrot.slane %v522_v11, %v2682_v39  ;;  %v535_v13 = vrot.slane %v522_v11, %v134_v54 }
 0x18e   :  { %1756 = vmatprep.subr.bf16.mxu0 %v2361_v14  ;;  %1797 = vmatprep.subr.bf16.mxu1 %v2364_v15  ;;  %v531_v14 = vrot.slane %v522_v11, %v2690_v41  ;;  %v539_v15 = vrot.slane %v522_v11, %v138_v52 }
 0x191   :  { %1757 = vmatpush1.bf16.msra.mxu0 %v2359_v16  ;;  %1798 = vmatpush1.bf16.msra.mxu1 %v2362_v17 }
 0x192   :  { %1758 = vmatprep.subr.bf16.mxu0 %v2367_v18  ;;  %1799 = vmatprep.subr.bf16.mxu1 %v2370_v19 }
 0x195   :  { %1759 = vmatpush1.bf16.msra.mxu0 %v2365_v20  ;;  %1800 = vmatpush1.bf16.msra.mxu1 %v2368_v21 }
 0x196   :  { %1760 = vmatprep.subr.bf16.mxu0 %v2373_v22  ;;  %1801 = vmatprep.subr.bf16.mxu1 %v2376_v23 }
 0x199   :  { %1761 = vmatpush1.bf16.msra.mxu0 %v2371_v24  ;;  %1802 = vmatpush1.bf16.msra.mxu1 %v2374_v25 }
 0x19a   :  { %1762 = vmatprep.subr.bf16.mxu0 %v2379_v26  ;;  %1803 = vmatprep.subr.bf16.mxu1 %v2382_v27 }
 0x19d   :  { %1763 = vmatpush1.bf16.msra.mxu0 %v2377_v28  ;;  %1804 = vmatpush1.bf16.msra.mxu1 %v2380_v29 }
 0x19e   :  { %1764 = vmatprep.subr.bf16.mxu0 %v2385_v30  ;;  %1805 = vmatprep.subr.bf16.mxu1 %v2388_v31 }
 0x1a1   :  { %1765 = vmatpush1.bf16.msra.mxu0 %v2383_v32  ;;  %1806 = vmatpush1.bf16.msra.mxu1 %v2386_v33  ;;  %v1420_v33 = vld [vmem:[%s2745_s6] sm:$0x3] }
 0x1a2   :  { %1766 = vmatprep.subr.bf16.mxu0 %v2391_v34  ;;  %1807 = vmatprep.subr.bf16.mxu1 %v2394_v35  ;;  %v1425_v34 = vrot.slane %v1420_v33, %v2682_v39  ;;  %v1429_v35 = vrot.slane %v1420_v33, %v2690_v41  ;;  %v1836_v39 = vld [vmem:[%s2746_s7] sm:$0xff] }
 0x1a5   :  { %1767 = vmatpush1.bf16.msra.mxu0 %v2389_v36  ;;  %1808 = vmatpush1.bf16.msra.mxu1 %v2392_v37 }
 0x1a6   :  { %1768 = vmatprep.subr.bf16.mxu0 %v2397_v42  ;;  %1809 = vmatprep.subr.bf16.mxu1 %v2400_v43 }
 0x1a9   :  { %1769 = vmatpush1.bf16.msra.mxu0 %v2395_v44  ;;  %1810 = vmatpush1.bf16.msra.mxu1 %v2398_v45 }
 0x1aa   :  { %1770 = vmatprep.subr.bf16.mxu0 %v2403_v46  ;;  %1811 = vmatprep.subr.bf16.mxu1 %v2406_v47 }
 0x1ad   :  { %1771 = vmatpush1.bf16.msra.mxu0 %v2401_v48  ;;  %1812 = vmatpush1.bf16.msra.mxu1 %v2404_v49 }
 0x1ae   :  { %1772 = vmatprep.subr.bf16.mxu0 %v2409_v50  ;;  %1813 = vmatprep.subr.bf16.mxu1 %v2412_v51 }
 0x1b1   :  { %1773 = vmatpush1.bf16.msra.mxu0 %v2407_v53  ;;  %1814 = vmatpush1.bf16.msra.mxu1 %v2410_v55 }
 0x1b2   :  { %1774 = vmatprep.subr.bf16.mxu0 %v2415_v56  ;;  %1815 = vmatprep.subr.bf16.mxu1 %v2418_v57  ;;  %v1841_v57 = vstv %s2747_s8 }
 0x1b5   :  { %1775 = vmatpush1.bf16.msra.mxu0 %v2413_v58  ;;  %1816 = vmatpush1.bf16.msra.mxu1 %v2416_v59 }
 0x1b6   :  { %1776 = vmatprep.subr.bf16.mxu0 %v2421_v60  ;;  %1817 = vmatprep.subr.bf16.mxu1 %v2424_v61 }
 0x1b9   :  { %1777 = vmatpush1.bf16.msra.mxu0 %v2419_v62  ;;  %1818 = vmatpush1.bf16.msra.mxu1 %v2422_v63 }
 0x1ba   :  { %1778 = vmatprep.subr.bf16.mxu0 %v2427_v1  ;;  %1819 = vmatprep.subr.bf16.mxu1 %v2430_v2 }
 0x1bd   :  { %1779 = vmatpush1.bf16.msra.mxu0 %v2425_v3  ;;  %1820 = vmatpush1.bf16.msra.mxu1 %v2428_v4 }
 0x1be   :  { %1780 = vmatprep.subr.bf16.mxu0 %v2433_v5  ;;  %1821 = vmatprep.subr.bf16.mxu1 %v2436_v6 }
 0x1c1   :  { %1781 = vmatpush1.bf16.msra.mxu0 %v2431_v40  ;;  %1822 = vmatpush1.bf16.msra.mxu1 %v2434_v7 }
 0x1c2   :  { %1782 = vmatprep.subr.bf16.mxu0 %v2439_v8  ;;  %1823 = vmatprep.subr.bf16.mxu1 %v2442_v9 }
 0x1c5   :  { %1783 = vmatpush1.bf16.msra.mxu0 %v2437_v10  ;;  %1824 = vmatpush1.bf16.msra.mxu1 %v2440_v0 }
 0x25b   :  { %v1259_v16 = vpop.f32.mrb[4].mxu0  ;;  %v1341_v17 = vpop.f32.mrb[4].mxu1 }
 0x25c   :  { %v2085_v18 = vadd.f32 %v1259_v16, %v527_v12  ;;  %v2087_v19 = vadd.f32 %v1341_v17, %v535_v13  ;;  %v1261_v20 = vpop.f32.mrb[5].mxu0  ;;  %v1343_v21 = vpop.f32.mrb[5].mxu1 }
 0x25d   :  { %v2086_v22 = vadd.f32 %v1261_v20, %v531_v14  ;;  %v2088_v23 = vadd.f32 %v1343_v21, %v539_v15  ;;  %v1263_v24 = vpop.f32.mrb[6].mxu0  ;;  %v1345_v25 = vpop.f32.mrb[6].mxu1 }
 0x25e   :  { %v1348_v26 = vmax.f32 %v2085_v18, 0.0  ;;  %v1350_v27 = vmax.f32 %v2087_v19, 0.0  ;;  %v1264_v28 = vpop.f32.mrb[7].mxu0  ;;  %v1346_v29 = vpop.f32.mrb[7].mxu1 }
 0x25f   :  { %v1349_v54 = vmax.f32 %v2086_v22, 0.0  ;;  %v1351_v30 = vmax.f32 %v2088_v23, 0.0 }
 0x260   :  { %v1352_v38 = vpack.c.bf16 %v1348_v26, %v1348_v26  ;;  %v1354_v52 = vpack.c.bf16 %v1350_v27, %v1350_v27 }
 0x261   :  { %v1353_v31 = vpack.c.bf16 %v1349_v54, %v1349_v54  ;;  %v1355_v32 = vpack.c.bf16 %v1351_v30, %v1351_v30 }
 0x263   :  { %1784 = vmatprep.mubr.bf16.mxu0 %v1353_v31  ;;  %1825 = vmatprep.mubr.bf16.mxu1 %v1355_v32 }
 0x264   :  { %1785 = vmatmul.mubr.bf16.vlgmr.msra.gmra.mrb[8].mxu0 %v1352_v38  ;;  %1826 = vmatmul.mubr.bf16.vlgmr.msra.gmra.mrb[8].mxu1 %v1354_v52 }
 0x337   :  { %v1786_v36 = vpop.f32.mrb[8].mxu0  ;;  %v1827_v37 = vpop.f32.mrb[8].mxu1 }
 0x338   :  { %v1787_v42 = vadd.f32 %v1786_v36, %v1425_v34  ;;  %v1788_v43 = vpop.f32.mrb[9].mxu0  ;;  %v1829_v44 = vpop.f32.mrb[9].mxu1 }
 0x339   :  { %v1789_v45 = vadd.f32 %v1788_v43, %v1429_v35  ;;  %v1790_v46 = vpop.f32.mrb[10].mxu0  ;;  %v1831_v47 = vpop.f32.mrb[10].mxu1 }
 0x33a   :  { %v1828_v48 = vadd.f32 %v1827_v37, %v1787_v42  ;;  %v1791_v49 = vpop.f32.mrb[11].mxu0  ;;  %v1832_v50 = vpop.f32.mrb[11].mxu1 }
 0x33b   :  { %v1830_v51 = vadd.f32 %v1829_v44, %v1789_v45 }
 0x33d   :  { %v1834_v53 = vmul.f32 1.442695, %v1830_v51 }
 0x33f   :  { %2443 = vpow2.f32 %v1834_v53 }
 0x349   :  { %v2444_v55 = vpop.eup %2443 }
 0x34a   :  { %v1837_v41 = vmul.f32 %v2444_v55, %v1836_v39 }
 0x34c   :  { %v1838_v56 = vadd.f32 %v1837_v41, %v1828_v48 }
 0x34e   :  { %2445 = vtanh.f32 %v1838_v56 }
 0x358   :  { %v2446_v58 = vpop.eup %2445 }
 0x359   :  { %v1842_v59 = vmul.f32 %v2446_v58, %v1841_v57 }
 0x35b   :  { %1843 = vst [vmem:[#allocation11] sm:$0xff] %v1842_v59 }
 0x35c   :  { %2546 = shalt.err (!%p2543_p8)
}
 0x35d   :  { %s2547_s27 = scalar_lea.hbm %s2748_s9, 128 }
 0x35e   :  { %p2548_p9 = scmp.ne.s32.totalorder %s2748_s9, %s2547_s27  ;;  %p2551_p10 = scmp.lt.u32.totalorder %s2547_s27, %s2748_s9 }
 0x360   :  { %p2553_p11 = pnand %p2551_p10, %p2548_p9 }
 0x362   :  { %2556 = shalt.err (!%p2553_p11)
}
 0x363   :  { %1853 = dma.vmem_to_hbm [thread:$0]  %s1851_s25, 128, %s2748_s9, [#allocation5]  }
 0x364   :  { %2563 = dma.done.wait [#allocation5], 128  }
 0x365   :  { %2564 = vsyncadd [#allocation5], 4294967168 }
 0x366   :  { %1857 = vsyncpa [#allocation4], 1 }
 0x367   :  { %1858 = vsyncpa [#allocation7], 1 }
 0x368   :  { %1859 = vsyncpa [#allocation10], 1 }
 0x369   :  { %1860 = vsyncpa [#allocation5], 1 }

</bundles_post_ra>
